<compile_context>
chip_gen: v6e
topology: v6e:2x2x1
jax: 0.10.0
libtpu: 0.0.40
codegen_flags: <defaults>
</compile_context>

<pallas_src>
import functools

import jax
import jax.numpy as jnp
from jax.experimental import pallas as pl
from jax.experimental.pallas import tpu as pltpu


# ----------------------------- Pallas kernel ------------------------------ #

def _make_qmodel_kernel(num_hidden):
    """Build a fused MLP kernel for `num_hidden` (Linear+ReLU) stages + packed heads."""

    def kernel(*refs):
        x_ref = refs[0]
        o_ref = refs[-1]
        wb = refs[1:-1]  # w0, b0, ..., w_{nh-1}, b_{nh-1}, wf, bf

        # x arrives in f32; cast to bf16 in-kernel (VPU slot has slack).
        h = x_ref[...].astype(jnp.bfloat16)
        for i in range(num_hidden):                      # unrolled at trace time
            w = wb[2 * i][...]                           # bf16 weights (in, out)
            b = wb[2 * i + 1][...]                       # f32 bias (1, out)
            acc = jnp.dot(h, w, preferred_element_type=jnp.float32)
            h = jnp.maximum(acc + b, 0.0).astype(w.dtype)

        wf = wb[2 * num_hidden][...]                     # (H_last, out_pad) bf16
        bf = wb[2 * num_hidden + 1][...]                 # (1, out_pad) f32
        out = jnp.dot(h, wf, preferred_element_type=jnp.float32) + bf
        o_ref[...] = out.astype(o_ref.dtype)

    return kernel


def _round_up(v, m):
    return ((v + m - 1) // m) * m


# ------------------------ One-time parameter prep -------------------------- #

def prepare_params(params):
    """Cast / pack weights once so the forward pass does zero wrapper-side work.

    Weights -> bf16, biases -> f32; packed quantile heads zero-padded to a
    multiple of 8 output columns.  Returns (prepped_dict, out_dim).
    """
    num_hidden = sum(1 for k in params if k.startswith("w") and k != "wf")
    out_dim = params["wf"].shape[1]
    out_pad = _round_up(out_dim, 8)

    prepped = {}
    for i in range(num_hidden):
        prepped[f"w{i}"] = params[f"w{i}"].astype(jnp.bfloat16)
        prepped[f"b{i}"] = params[f"b{i}"].astype(jnp.float32)

    wf = params["wf"].astype(jnp.bfloat16)
    bf = params["bf"].astype(jnp.float32)
    if out_pad != out_dim:
        wf = jnp.pad(wf, ((0, 0), (0, out_pad - out_dim)))
        bf = jnp.pad(bf, ((0, 0), (0, out_pad - out_dim)))
    prepped["wf"] = wf
    prepped["bf"] = bf
    return prepped, out_dim


# ------------------------------ Forward pass -------------------------------- #

@functools.partial(jax.jit, static_argnames=("out_dim", "tile_b"))
def q_model_forward(x, prepped, *, out_dim, tile_b=1024):
    """Fused forward pass via a single batch-gridded pallas_call.

    x:       (B, input_layer) float32
    prepped: output of prepare_params (bf16 weights, f32 biases, padded heads)
    returns  (B, out_dim) float32   where out_dim = num_quantiles * output_layer
    """
    B, in_dim = x.shape
    num_hidden = sum(1 for k in prepped if k.startswith("w") and k != "wf")
    out_pad = prepped["wf"].shape[1]

    # --- batch tiling: weights resident, x/out double-buffered over the grid ---
    tile_b = max(8, min(int(tile_b), _round_up(B, 8)))
    tile_b = _round_up(tile_b, 8)                     # Mosaic (8,128) rule
    if (_round_up(B, tile_b) // tile_b) < 2 and B > 8:
        # Keep >= 2 grid steps so v7x's two TensorCores both get work.
        tile_b = _round_up(pl.cdiv(B, 2), 8)
    b_pad = _round_up(B, tile_b)
    grid = (b_pad // tile_b,)

    xb = x
    if b_pad != B:
        xb = jnp.pad(xb, ((0, b_pad - B), (0, 0)))

    wb_args = []
    for i in range(num_hidden):
        wb_args.append(prepped[f"w{i}"])
        wb_args.append(prepped[f"b{i}"])
    wb_args.append(prepped["wf"])
    wb_args.append(prepped["bf"])
    args = (xb, *wb_args)

    in_specs = [pl.BlockSpec((tile_b, in_dim), lambda i: (i, 0))]
    # Weights / biases: full-array blocks, constant index_map -> stay resident in VMEM.
    in_specs += [pl.BlockSpec(a.shape, lambda i: (0, 0)) for a in wb_args]

    out_shape = jax.ShapeDtypeStruct((b_pad, out_pad), jnp.float32)
    out_spec = pl.BlockSpec((tile_b, out_pad), lambda i: (i, 0))

    # Advisory cost estimate (flops of the matmul chain, byte traffic of all operands).
    dims = [in_dim] + [prepped[f"w{i}"].shape[1] for i in range(num_hidden)] + [out_pad]
    flops = 2 * b_pad * sum(dims[i] * dims[i + 1] for i in range(len(dims) - 1))
    bytes_accessed = (
        xb.size * xb.dtype.itemsize
        + sum(a.size * a.dtype.itemsize for a in wb_args)
        + b_pad * out_pad * 4
    )

    out_full = pl.pallas_call(
        _make_qmodel_kernel(num_hidden),
        out_shape=out_shape,
        grid=grid,
        in_specs=in_specs,
        out_specs=out_spec,
        compiler_params=pltpu.CompilerParams(
            dimension_semantics=("parallel",),
        ),
        cost_estimate=pl.CostEstimate(
            flops=int(flops), transcendentals=0, bytes_accessed=int(bytes_accessed)
        ),
    )(*args)

    # Slice away batch / lane padding (layout plumbing only; padded rows never escape).
    return out_full[:B, :out_dim]


# ------------------------- Deterministic init ----------------------------- #

def _orthogonal(key, in_f, out_f):
    """Orthogonal init (matches nn.init.orthogonal_ semantics), stored as (in, out)."""
    if in_f >= out_f:
        a = jax.random.normal(key, (in_f, out_f), dtype=jnp.float32)
        q, _ = jnp.linalg.qr(a)          # orthonormal columns
        return q
    else:
        a = jax.random.normal(key, (out_f, in_f), dtype=jnp.float32)
        q, _ = jnp.linalg.qr(a)
        return q.T                        # orthonormal rows


def make_params(key, input_layer, output_layer, num_quantiles, hidden_layers):
    keys = jax.random.split(key, len(hidden_layers) + num_quantiles)
    params = {}
    dims = [input_layer] + list(hidden_layers)
    for i in range(len(hidden_layers)):
        params[f"w{i}"] = _orthogonal(keys[i], dims[i], dims[i + 1])
        params[f"b{i}"] = jnp.zeros((1, dims[i + 1]), dtype=jnp.float32)
    # Pack the per-quantile final Linear layers along the output axis
    # (== torch.cat([layer(h) for layer in final_layers], dim=1)).
    wf_list = [
        _orthogonal(keys[len(hidden_layers) + q], hidden_layers[-1], output_layer)
        for q in range(num_quantiles)
    ]
    params["wf"] = jnp.concatenate(wf_list, axis=1)               # (H_last, nq*out)
    params["bf"] = jnp.zeros((1, num_quantiles * output_layer), dtype=jnp.float32)
    return params


# --------------------------- Reference (pure JAX) -------------------------- #

def reference_forward(x, params):
    """Same bf16-matmul / f32-accumulate numerics as the kernel, in plain JAX."""
    num_hidden = sum(1 for k in params if k.startswith("w") and k != "wf")
    h = x.astype(jnp.bfloat16)
    for i in range(num_hidden):
        acc = jnp.dot(h, params[f"w{i}"].astype(jnp.bfloat16),
                      preferred_element_type=jnp.float32)
        h = jnp.maximum(acc + params[f"b{i}"], 0.0).astype(jnp.bfloat16)
    return (jnp.dot(h, params["wf"].astype(jnp.bfloat16),
                    preferred_element_type=jnp.float32)
            + params["bf"])


# --------------------------------- Main ------------------------------------ #

if __name__ == "__main__":
    # Small, structure-consistent shapes; 128-wide hiddens for lane-native matmuls.
    input_layer = 32
    output_layer = 1
    quantiles = [0.1, 0.5, 0.9]
    num_quantiles = len(quantiles)
    hidden_layers = [128, 128, 128, 128, 128]
    batch = 256                       # tile_b auto-adjusts to 128 -> grid of 2 tiles

    key = jax.random.PRNGKey(0)
    kx, kp = jax.random.split(key)
    x = jax.random.normal(kx, (batch, input_layer), dtype=jnp.float32)
    params = make_params(kp, input_layer, output_layer, num_quantiles, hidden_layers)

    # One-time parameter packing (bf16 weights, padded quantile heads).
    prepped, out_dim = prepare_params(params)
    prepped = jax.block_until_ready(prepped)

    out = q_model_forward(x, prepped, out_dim=out_dim)
    out = jax.block_until_ready(out)

    ref = reference_forward(x, params)
    assert out.shape == (batch, num_quantiles * output_layer), out.shape
    max_err = float(jnp.max(jnp.abs(out - ref)))
    assert jnp.allclose(out, ref, atol=2e-2, rtol=2e-2), max_err

    print("KERNEL_OK")
</pallas_src>

<mosaic_0001>
module attributes {stable_mosaic.version = 11 : i64} {
  func.func @kernel(%arg0: i32, %arg1: memref<128x32xf32, #tpu.memory_space<vmem>>, %arg2: memref<32x128xbf16, #tpu.memory_space<vmem>>, %arg3: memref<1x128xf32, #tpu.memory_space<vmem>>, %arg4: memref<128x128xbf16, #tpu.memory_space<vmem>>, %arg5: memref<1x128xf32, #tpu.memory_space<vmem>>, %arg6: memref<128x128xbf16, #tpu.memory_space<vmem>>, %arg7: memref<1x128xf32, #tpu.memory_space<vmem>>, %arg8: memref<128x128xbf16, #tpu.memory_space<vmem>>, %arg9: memref<1x128xf32, #tpu.memory_space<vmem>>, %arg10: memref<128x128xbf16, #tpu.memory_space<vmem>>, %arg11: memref<1x128xf32, #tpu.memory_space<vmem>>, %arg12: memref<128x8xbf16, #tpu.memory_space<vmem>>, %arg13: memref<1x8xf32, #tpu.memory_space<vmem>>, %arg14: memref<128x8xf32, #tpu.memory_space<vmem>>) attributes {dimension_semantics = [#tpu.dimension_semantics<parallel>], iteration_bounds = array<i64: 2>, scalar_prefetch = 0 : i64, scratch_operands = 0 : i64, tpu.core_type = #tpu.core_type<tc>, window_params = [{transform_indices = @transform_0, window_bounds = array<i64: 128, 32>}, {pipeline_mode = #tpu.pipeline_mode<synchronous>, transform_indices = @transform_1, window_bounds = array<i64: 32, 128>}, {pipeline_mode = #tpu.pipeline_mode<synchronous>, transform_indices = @transform_2, window_bounds = array<i64: 1, 128>}, {pipeline_mode = #tpu.pipeline_mode<synchronous>, transform_indices = @transform_3, window_bounds = array<i64: 128, 128>}, {pipeline_mode = #tpu.pipeline_mode<synchronous>, transform_indices = @transform_4, window_bounds = array<i64: 1, 128>}, {pipeline_mode = #tpu.pipeline_mode<synchronous>, transform_indices = @transform_5, window_bounds = array<i64: 128, 128>}, {pipeline_mode = #tpu.pipeline_mode<synchronous>, transform_indices = @transform_6, window_bounds = array<i64: 1, 128>}, {pipeline_mode = #tpu.pipeline_mode<synchronous>, transform_indices = @transform_7, window_bounds = array<i64: 128, 128>}, {pipeline_mode = #tpu.pipeline_mode<synchronous>, transform_indices = @transform_8, window_bounds = array<i64: 1, 128>}, {pipeline_mode = #tpu.pipeline_mode<synchronous>, transform_indices = @transform_9, window_bounds = array<i64: 128, 128>}, {pipeline_mode = #tpu.pipeline_mode<synchronous>, transform_indices = @transform_10, window_bounds = array<i64: 1, 128>}, {pipeline_mode = #tpu.pipeline_mode<synchronous>, transform_indices = @transform_11, window_bounds = array<i64: 128, 8>}, {pipeline_mode = #tpu.pipeline_mode<synchronous>, transform_indices = @transform_12, window_bounds = array<i64: 1, 8>}, {transform_indices = @transform_13, window_bounds = array<i64: 128, 8>}]} {
    %c0 = arith.constant 0 : index
    %c0_0 = arith.constant 0 : index
    %0 = vector.load %arg1[%c0, %c0_0] : memref<128x32xf32, #tpu.memory_space<vmem>>, vector<128x32xf32>
    %1 = arith.truncf %0 : vector<128x32xf32> to vector<128x32xbf16>
    %c0_1 = arith.constant 0 : index
    %c0_2 = arith.constant 0 : index
    %2 = vector.load %arg2[%c0_1, %c0_2] : memref<32x128xbf16, #tpu.memory_space<vmem>>, vector<32x128xbf16>
    %c0_3 = arith.constant 0 : index
    %c0_4 = arith.constant 0 : index
    %3 = vector.load %arg3[%c0_3, %c0_4] : memref<1x128xf32, #tpu.memory_space<vmem>>, vector<1x128xf32>
    %cst = arith.constant dense<0.000000e+00> : vector<128x128xf32>
    %4 = tpu.matmul %1, %2, %cst {dimension_numbers = #tpu.dot_dimension_numbers<[1], [0], [0], [1], [0, 0, 1, 1], [], []>} : vector<128x32xbf16>, vector<32x128xbf16>, vector<128x128xf32> -> vector<128x128xf32>
    %5 = vector.broadcast %3 : vector<1x128xf32> to vector<128x128xf32>
    %6 = arith.addf %4, %5 : vector<128x128xf32>
    %cst_5 = arith.constant 0.000000e+00 : f32
    %7 = vector.broadcast %cst_5 : f32 to vector<128x128xf32>
    %8 = arith.maximumf %6, %7 : vector<128x128xf32>
    %9 = arith.truncf %8 : vector<128x128xf32> to vector<128x128xbf16>
    %c0_6 = arith.constant 0 : index
    %c0_7 = arith.constant 0 : index
    %10 = vector.load %arg4[%c0_6, %c0_7] : memref<128x128xbf16, #tpu.memory_space<vmem>>, vector<128x128xbf16>
    %c0_8 = arith.constant 0 : index
    %c0_9 = arith.constant 0 : index
    %11 = vector.load %arg5[%c0_8, %c0_9] : memref<1x128xf32, #tpu.memory_space<vmem>>, vector<1x128xf32>
    %cst_10 = arith.constant dense<0.000000e+00> : vector<128x128xf32>
    %12 = tpu.matmul %9, %10, %cst_10 {dimension_numbers = #tpu.dot_dimension_numbers<[1], [0], [0], [1], [0, 0, 1, 1], [], []>} : vector<128x128xbf16>, vector<128x128xbf16>, vector<128x128xf32> -> vector<128x128xf32>
    %13 = vector.broadcast %11 : vector<1x128xf32> to vector<128x128xf32>
    %14 = arith.addf %12, %13 : vector<128x128xf32>
    %cst_11 = arith.constant 0.000000e+00 : f32
    %15 = vector.broadcast %cst_11 : f32 to vector<128x128xf32>
    %16 = arith.maximumf %14, %15 : vector<128x128xf32>
    %17 = arith.truncf %16 : vector<128x128xf32> to vector<128x128xbf16>
    %c0_12 = arith.constant 0 : index
    %c0_13 = arith.constant 0 : index
    %18 = vector.load %arg6[%c0_12, %c0_13] : memref<128x128xbf16, #tpu.memory_space<vmem>>, vector<128x128xbf16>
    %c0_14 = arith.constant 0 : index
    %c0_15 = arith.constant 0 : index
    %19 = vector.load %arg7[%c0_14, %c0_15] : memref<1x128xf32, #tpu.memory_space<vmem>>, vector<1x128xf32>
    %cst_16 = arith.constant dense<0.000000e+00> : vector<128x128xf32>
    %20 = tpu.matmul %17, %18, %cst_16 {dimension_numbers = #tpu.dot_dimension_numbers<[1], [0], [0], [1], [0, 0, 1, 1], [], []>} : vector<128x128xbf16>, vector<128x128xbf16>, vector<128x128xf32> -> vector<128x128xf32>
    %21 = vector.broadcast %19 : vector<1x128xf32> to vector<128x128xf32>
    %22 = arith.addf %20, %21 : vector<128x128xf32>
    %cst_17 = arith.constant 0.000000e+00 : f32
    %23 = vector.broadcast %cst_17 : f32 to vector<128x128xf32>
    %24 = arith.maximumf %22, %23 : vector<128x128xf32>
    %25 = arith.truncf %24 : vector<128x128xf32> to vector<128x128xbf16>
    %c0_18 = arith.constant 0 : index
    %c0_19 = arith.constant 0 : index
    %26 = vector.load %arg8[%c0_18, %c0_19] : memref<128x128xbf16, #tpu.memory_space<vmem>>, vector<128x128xbf16>
    %c0_20 = arith.constant 0 : index
    %c0_21 = arith.constant 0 : index
    %27 = vector.load %arg9[%c0_20, %c0_21] : memref<1x128xf32, #tpu.memory_space<vmem>>, vector<1x128xf32>
    %cst_22 = arith.constant dense<0.000000e+00> : vector<128x128xf32>
    %28 = tpu.matmul %25, %26, %cst_22 {dimension_numbers = #tpu.dot_dimension_numbers<[1], [0], [0], [1], [0, 0, 1, 1], [], []>} : vector<128x128xbf16>, vector<128x128xbf16>, vector<128x128xf32> -> vector<128x128xf32>
    %29 = vector.broadcast %27 : vector<1x128xf32> to vector<128x128xf32>
    %30 = arith.addf %28, %29 : vector<128x128xf32>
    %cst_23 = arith.constant 0.000000e+00 : f32
    %31 = vector.broadcast %cst_23 : f32 to vector<128x128xf32>
    %32 = arith.maximumf %30, %31 : vector<128x128xf32>
    %33 = arith.truncf %32 : vector<128x128xf32> to vector<128x128xbf16>
    %c0_24 = arith.constant 0 : index
    %c0_25 = arith.constant 0 : index
    %34 = vector.load %arg10[%c0_24, %c0_25] : memref<128x128xbf16, #tpu.memory_space<vmem>>, vector<128x128xbf16>
    %c0_26 = arith.constant 0 : index
    %c0_27 = arith.constant 0 : index
    %35 = vector.load %arg11[%c0_26, %c0_27] : memref<1x128xf32, #tpu.memory_space<vmem>>, vector<1x128xf32>
    %cst_28 = arith.constant dense<0.000000e+00> : vector<128x128xf32>
    %36 = tpu.matmul %33, %34, %cst_28 {dimension_numbers = #tpu.dot_dimension_numbers<[1], [0], [0], [1], [0, 0, 1, 1], [], []>} : vector<128x128xbf16>, vector<128x128xbf16>, vector<128x128xf32> -> vector<128x128xf32>
    %37 = vector.broadcast %35 : vector<1x128xf32> to vector<128x128xf32>
    %38 = arith.addf %36, %37 : vector<128x128xf32>
    %cst_29 = arith.constant 0.000000e+00 : f32
    %39 = vector.broadcast %cst_29 : f32 to vector<128x128xf32>
    %40 = arith.maximumf %38, %39 : vector<128x128xf32>
    %41 = arith.truncf %40 : vector<128x128xf32> to vector<128x128xbf16>
    %c0_30 = arith.constant 0 : index
    %c0_31 = arith.constant 0 : index
    %42 = vector.load %arg12[%c0_30, %c0_31] : memref<128x8xbf16, #tpu.memory_space<vmem>>, vector<128x8xbf16>
    %c0_32 = arith.constant 0 : index
    %c0_33 = arith.constant 0 : index
    %43 = vector.load %arg13[%c0_32, %c0_33] : memref<1x8xf32, #tpu.memory_space<vmem>>, vector<1x8xf32>
    %cst_34 = arith.constant dense<0.000000e+00> : vector<128x8xf32>
    %44 = tpu.matmul %41, %42, %cst_34 {dimension_numbers = #tpu.dot_dimension_numbers<[1], [0], [0], [1], [0, 0, 1, 1], [], []>} : vector<128x128xbf16>, vector<128x8xbf16>, vector<128x8xf32> -> vector<128x8xf32>
    %45 = vector.broadcast %43 : vector<1x8xf32> to vector<128x8xf32>
    %46 = arith.addf %44, %45 : vector<128x8xf32>
    %c0_35 = arith.constant 0 : index
    %c0_36 = arith.constant 0 : index
    %47 = vector.load %arg14[%c0_35, %c0_36] : memref<128x8xf32, #tpu.memory_space<vmem>>, vector<128x8xf32>
    tpu.vector_store %arg14[%c0_35, %c0_36], %46 {strides = array<i32>} : memref<128x8xf32, #tpu.memory_space<vmem>>, vector<128x8xf32>,
    return
  }
  func.func @transform_0(%arg0: i32) -> (i32, i32) {
    %c0_i32 = arith.constant 0 : i32
    %c0_i32_0 = arith.constant 0 : i32
    return %arg0, %c0_i32 : i32, i32
  }
  func.func @transform_1(%arg0: i32) -> (i32, i32) {
    %c0_i32 = arith.constant 0 : i32
    %c0_i32_0 = arith.constant 0 : i32
    %c0_i32_1 = arith.constant 0 : i32
    return %c0_i32, %c0_i32_0 : i32, i32
  }
  func.func @transform_2(%arg0: i32) -> (i32, i32) {
    %c0_i32 = arith.constant 0 : i32
    %c0_i32_0 = arith.constant 0 : i32
    %c0_i32_1 = arith.constant 0 : i32
    return %c0_i32, %c0_i32_0 : i32, i32
  }
  func.func @transform_3(%arg0: i32) -> (i32, i32) {
    %c0_i32 = arith.constant 0 : i32
    %c0_i32_0 = arith.constant 0 : i32
    %c0_i32_1 = arith.constant 0 : i32
    return %c0_i32, %c0_i32_0 : i32, i32
  }
  func.func @transform_4(%arg0: i32) -> (i32, i32) {
    %c0_i32 = arith.constant 0 : i32
    %c0_i32_0 = arith.constant 0 : i32
    %c0_i32_1 = arith.constant 0 : i32
    return %c0_i32, %c0_i32_0 : i32, i32
  }
  func.func @transform_5(%arg0: i32) -> (i32, i32) {
    %c0_i32 = arith.constant 0 : i32
    %c0_i32_0 = arith.constant 0 : i32
    %c0_i32_1 = arith.constant 0 : i32
    return %c0_i32, %c0_i32_0 : i32, i32
  }
  func.func @transform_6(%arg0: i32) -> (i32, i32) {
    %c0_i32 = arith.constant 0 : i32
    %c0_i32_0 = arith.constant 0 : i32
    %c0_i32_1 = arith.constant 0 : i32
    return %c0_i32, %c0_i32_0 : i32, i32
  }
  func.func @transform_7(%arg0: i32) -> (i32, i32) {
    %c0_i32 = arith.constant 0 : i32
    %c0_i32_0 = arith.constant 0 : i32
    %c0_i32_1 = arith.constant 0 : i32
    return %c0_i32, %c0_i32_0 : i32, i32
  }
  func.func @transform_8(%arg0: i32) -> (i32, i32) {
    %c0_i32 = arith.constant 0 : i32
    %c0_i32_0 = arith.constant 0 : i32
    %c0_i32_1 = arith.constant 0 : i32
    return %c0_i32, %c0_i32_0 : i32, i32
  }
  func.func @transform_9(%arg0: i32) -> (i32, i32) {
    %c0_i32 = arith.constant 0 : i32
    %c0_i32_0 = arith.constant 0 : i32
    %c0_i32_1 = arith.constant 0 : i32
    return %c0_i32, %c0_i32_0 : i32, i32
  }
  func.func @transform_10(%arg0: i32) -> (i32, i32) {
    %c0_i32 = arith.constant 0 : i32
    %c0_i32_0 = arith.constant 0 : i32
    %c0_i32_1 = arith.constant 0 : i32
    return %c0_i32, %c0_i32_0 : i32, i32
  }
  func.func @transform_11(%arg0: i32) -> (i32, i32) {
    %c0_i32 = arith.constant 0 : i32
    %c0_i32_0 = arith.constant 0 : i32
    %c0_i32_1 = arith.constant 0 : i32
    return %c0_i32, %c0_i32_0 : i32, i32
  }
  func.func @transform_12(%arg0: i32) -> (i32, i32) {
    %c0_i32 = arith.constant 0 : i32
    %c0_i32_0 = arith.constant 0 : i32
    %c0_i32_1 = arith.constant 0 : i32
    return %c0_i32, %c0_i32_0 : i32, i32
  }
  func.func @transform_13(%arg0: i32) -> (i32, i32) {
    %c0_i32 = arith.constant 0 : i32
    %c0_i32_0 = arith.constant 0 : i32
    return %arg0, %c0_i32 : i32, i32
  }
}

</mosaic_0001>

<bundles_post_ra>
// kernel: q_model_forward.1
= control target key start
LH: loop header
LB: loop body
LE: loop exit
PB: predicated region body
PF: predicated region fallthrough
CT: control target
= control target key end

     0   :  { %s2128_s25 = smov 0   ;;  %s2362_s0 = inlined_call_operand.vmem [shape: f32[256,32], index: 0, kind: input, shape index: {}]   ;;  %s2363_s1 = inlined_call_operand.vmem [shape: bf16[32,128], index: 1, kind: input, shape index: {}]   ;;  %s2364_s2 = inlined_call_operand.vmem [shape: f32[1,128], index: 2, kind: input, shape index: {}]   ;;  %s2365_s3 = inlined_call_operand.vmem [shape: bf16[128,128], index: 3, kind: input, shape index: {}]   ;;  %s2366_s4 = inlined_call_operand.vmem [shape: f32[1,128], index: 4, kind: input, shape index: {}]   ;;  %s2367_s5 = inlined_call_operand.vmem [shape: bf16[128,128], index: 5, kind: input, shape index: {}]   ;;  %s2368_s6 = inlined_call_operand.vmem [shape: f32[1,128], index: 6, kind: input, shape index: {}]   ;;  %s2369_s7 = inlined_call_operand.vmem [shape: bf16[128,128], index: 7, kind: input, shape index: {}]   ;;  %s2370_s8 = inlined_call_operand.vmem [shape: f32[1,128], index: 8, kind: input, shape index: {}]   ;;  %s2371_s9 = inlined_call_operand.vmem [shape: bf16[128,128], index: 9, kind: input, shape index: {}]   ;;  %s2372_s10 = inlined_call_operand.vmem [shape: f32[1,128], index: 10, kind: input, shape index: {}]   ;;  %s2373_s11 = inlined_call_operand.vmem [shape: bf16[128,8], index: 11, kind: input, shape index: {}]   ;;  %s2374_s12 = inlined_call_operand.vmem [shape: f32[1,8], index: 12, kind: input, shape index: {}]   ;;  %s2375_s13 = inlined_call_operand.vmem [shape: f32[256,8], index: 13, kind: output, shape index: {}]  }
   0x1 LB: > { %s1647_s26 = sadd.s32 4294967295, %s2056_s25   ;;  %p1651_p0 = scmp.ge.s32.totalorder %s2056_s25, 1  ;;  %s2056_s25 = sphi %s2128_s25, %s23_s25  }
   0x2   : > { %p388_p1 = scmp.lt.s32.totalorder %s2056_s25, 3 }
   0x4   : > { %p389_p2 = pnand %p1651_p0, %p388_p1 }
   0x5   : > { %s1652_s29 = sshll.u32 (!%p389_p2), %s1647_s26, 4 }
   0x6   : > { %392 = sbr.rel (%p389_p2) target bundleno = 1276 (0x4fc), region = 72  ;;  %p433_p3 = scmp.lt.s32.totalorder (!%p389_p2), %s1652_s29, 31 }
   0xb   : > { %v2008_v0 = vld [vmem:[%s2363_s1 + $0x8] sm:$0xff]   ;;  %v2009_v1 = vld [vmem:[%s2363_s1] sm:$0xff]   ;;  %v2010_v2 = vld [vmem:[%s2365_s3 + $0x38] sm:$0xff]   ;;  %s2377_s29 = smov (!%p433_p3, %s1652_s29), 31  ;;  %vm492_vm0 = vcmask 261120   ;;  %vm1574_vm1 = vcmask 64512  }
   0xc   : > { %1804 = vmatprep.subr.bf16.mxu0 %v2008_v0  ;;  %v2011_v3 = vld [vmem:[%s2365_s3 + $0x30] sm:$0xff]   ;;  %1824 = vmatprep.subr.bf16.mxu1 %v2010_v2  ;;  %s1653_s19 = sshll.u32 %s2377_s29, 3  ;;  %v2012_v4 = vld [vmem:[%s2365_s3 + $0x28] sm:$0xff]   ;;  %v2013_v14 = vld [vmem:[%s2365_s3 + $0x20] sm:$0xff]  }
   0xd   : > { %1805 = vmatpush3.bf16.msra.mxu0 %v2008_v0  ;;  %1825 = vmatpush3.bf16.msra.mxu1 %v2010_v2  ;;  %s2156_s22 = scalar_lea.vmem %s2362_s0, %s1653_s19  ;;  %v2014_v19 = vld [vmem:[%s2365_s3 + $0x18] sm:$0xff]   ;;  %v2015_v31 = vld [vmem:[%s2365_s3 + $0x10] sm:$0xff]   ;;  %v2016_v32 = vld [vmem:[%s2365_s3 + $0x8] sm:$0xff]   ;;  %s2325_s14 = scalar_lea.vmem %s2375_s13, %s1653_s19 }
   0xe   : > { %1806 = vmatprep.subr.bf16.mxu0 %v2009_v1  ;;  %1826 = vmatprep.subr.bf16.mxu1 %v2011_v3  ;;  %v445_v5 = vld [vmem:[%s2156_s22] sm:$0xff]  ;;  %v446_v6 = vld [vmem:[%s2156_s22 + $0x8] sm:$0xff]  ;;  %v447_v7 = vld [vmem:[%s2156_s22 + $0x10] sm:$0xff] }
   0xf   : > { %v461_v8 = vpack.c.bf16 %v446_v6, %v445_v5  ;;  %v448_v9 = vld [vmem:[%s2156_s22 + $0x18] sm:$0xff]  ;;  %v449_v10 = vld [vmem:[%s2156_s22 + $0x20] sm:$0xff]  ;;  %v450_v11 = vld [vmem:[%s2156_s22 + $0x28] sm:$0xff] }
  0x10   : > { %v462_v12 = vpack.c.bf16 %v448_v9, %v447_v7  ;;  %v463_v13 = vpack.c.bf16 %v450_v11, %v449_v10  ;;  %v451_v15 = vld [vmem:[%s2156_s22 + $0x30] sm:$0xff]  ;;  %v452_v16 = vld [vmem:[%s2156_s22 + $0x38] sm:$0xff]  ;;  %v453_v17 = vld [vmem:[%s2156_s22 + $0x40] sm:$0xff] }
  0x11   : > { %1807 = vmatpush3.bf16.msra.mxu0 %v2009_v1  ;;  %1827 = vmatpush3.bf16.msra.mxu1 %v2011_v3  ;;  %v454_v18 = vld [vmem:[%s2156_s22 + $0x48] sm:$0xff]  ;;  %v464_v20 = vpack.c.bf16 %v452_v16, %v451_v15  ;;  %v455_v22 = vld [vmem:[%s2156_s22 + $0x50] sm:$0xff]  ;;  %v456_v23 = vld [vmem:[%s2156_s22 + $0x58] sm:$0xff] }
  0x12   : > { %1808 = vmatprep.mubr.msk.bf16.mxu0 %vm492_vm0, %v461_v8  ;;  %1828 = vmatprep.subr.bf16.mxu1 %v2012_v4  ;;  %v465_v21 = vpack.c.bf16 %v454_v18, %v453_v17  ;;  %v457_v24 = vld [vmem:[%s2156_s22 + $0x60] sm:$0xff]  ;;  %v458_v25 = vld [vmem:[%s2156_s22 + $0x68] sm:$0xff]  ;;  %v466_v26 = vpack.c.bf16 %v456_v23, %v455_v22  ;;  %v459_v28 = vld [vmem:[%s2156_s22 + $0x70] sm:$0xff] }
  0x13   : > { %v467_v27 = vpack.c.bf16 %v458_v25, %v457_v24  ;;  %v460_v29 = vld [vmem:[%s2156_s22 + $0x78] sm:$0xff]  ;;  %v2017_v33 = vld [vmem:[%s2365_s3] sm:$0xff]   ;;  %v2019_v35 = vld [vmem:[%s2367_s5 + $0x30] sm:$0xff]  }
  0x14   : > { %1809 = vmatmul.mubr.msk.bf16.vlgmr.msra.gmra.mxu0 %vm492_vm0, %v462_v12  ;;  %v468_v30 = vpack.c.bf16 %v460_v29, %v459_v28  ;;  %v2018_v34 = vld [vmem:[%s2367_s5 + $0x38] sm:$0xff]   ;;  %v2020_v36 = vld [vmem:[%s2367_s5 + $0x28] sm:$0xff]   ;;  %v2021_v37 = vld [vmem:[%s2367_s5 + $0x20] sm:$0xff]  }
  0x15   : > { %1812 = vmatprep.mubr.msk.bf16.mxu0 %vm492_vm0, %v463_v13  ;;  %1829 = vmatpush3.bf16.msra.mxu1 %v2012_v4  ;;  %v2022_v38 = vld [vmem:[%s2367_s5 + $0x18] sm:$0xff]   ;;  %v1656_v41 = vld [vmem:[%s2364_s2] ss:$0 sm:$0xff] }
  0x16   : > { %1830 = vmatprep.subr.bf16.mxu1 %v2013_v14  ;;  %1856 = vmatprep.subr.bf16.mxu0 %v2018_v34 }
  0x17   : > { %1857 = vmatpush3.bf16.msra.mxu0 %v2018_v34  ;;  %v2025_v34 = vld [vmem:[%s2367_s5] sm:$0xff]  }
  0x18   : > { %1858 = vmatprep.subr.bf16.mxu0 %v2019_v35 }
  0x19   : > { %1831 = vmatpush3.bf16.msra.mxu1 %v2013_v14 }
  0x1a   : > { %1832 = vmatprep.subr.bf16.mxu1 %v2014_v19 }
  0x1b   : > { %1859 = vmatpush3.bf16.msra.mxu0 %v2019_v35  ;;  %v2026_v35 = vld [vmem:[%s2369_s7 + $0x38] sm:$0xff]  }
  0x1c   : > { %1813 = vmatmul.mubr.msk.bf16.gmra.mxu0 %vm492_vm0, %v464_v20  ;;  %1860 = vmatprep.subr.bf16.mxu0 %v2020_v36 }
  0x1d   : > { %1816 = vmatprep.mubr.msk.bf16.mxu0 %vm492_vm0, %v465_v21  ;;  %1833 = vmatpush3.bf16.msra.mxu1 %v2014_v19 }
  0x1e   : > { %1834 = vmatprep.subr.bf16.mxu1 %v2015_v31 }
  0x1f   : > { %1861 = vmatpush3.bf16.msra.mxu0 %v2020_v36  ;;  %v2027_v36 = vld [vmem:[%s2369_s7 + $0x30] sm:$0xff]  }
  0x20   : > { %1862 = vmatprep.subr.bf16.mxu0 %v2021_v37 }
  0x21   : > { %1835 = vmatpush3.bf16.msra.mxu1 %v2015_v31 }
  0x22   : > { %1836 = vmatprep.subr.bf16.mxu1 %v2016_v32 }
  0x23   : > { %1863 = vmatpush3.bf16.msra.mxu0 %v2021_v37  ;;  %v2028_v37 = vld [vmem:[%s2369_s7 + $0x28] sm:$0xff]  }
  0x24   : > { %1817 = vmatmul.mubr.msk.bf16.gmra.mxu0 %vm492_vm0, %v466_v26  ;;  %1864 = vmatprep.subr.bf16.mxu0 %v2022_v38 }
  0x25   : > { %1820 = vmatprep.mubr.msk.bf16.mxu0 %vm492_vm0, %v467_v27  ;;  %1837 = vmatpush3.bf16.msra.mxu1 %v2016_v32  ;;  %v2023_v32 = vld [vmem:[%s2367_s5 + $0x10] sm:$0xff]  }
  0x26   : > { %1838 = vmatprep.subr.bf16.mxu1 %v2017_v33 }
  0x27   : > { %1865 = vmatpush3.bf16.msra.mxu0 %v2022_v38  ;;  %v2029_v38 = vld [vmem:[%s2369_s7 + $0x20] sm:$0xff]  }
  0x28   : > { %1866 = vmatprep.subr.bf16.mxu0 %v2023_v32 }
  0x29   : > { %1839 = vmatpush3.bf16.msra.mxu1 %v2017_v33  ;;  %v2024_v33 = vld [vmem:[%s2367_s5 + $0x8] sm:$0xff]  }
  0x2a   : > { %1888 = vmatprep.subr.bf16.mxu1 %v2026_v35 }
  0x2b   : > { %1867 = vmatpush3.bf16.msra.mxu0 %v2023_v32 }
  0x2c   : > { %1821 = vmatmul.mubr.msk.bf16.gmra.mxu0 %vm492_vm0, %v468_v30  ;;  %1868 = vmatprep.subr.bf16.mxu0 %v2024_v33 }
  0x2f   : > { %1869 = vmatpush3.bf16.msra.mxu0 %v2024_v33  ;;  %v2031_v33 = vld [vmem:[%s2369_s7 + $0x10] sm:$0xff]  }
  0x30   : > { %1870 = vmatprep.subr.bf16.mxu0 %v2025_v34 }
  0x33   : > { %1871 = vmatpush3.bf16.msra.mxu0 %v2025_v34  ;;  %v2032_v34 = vld [vmem:[%s2369_s7 + $0x8] sm:$0xff]  }
  0xd4   : > { %v1810_v39 = vpop.f32.mrf.mxu0 }
  0xd5   : > { %v560_v45 = vadd.f32 %v1810_v39, %v1656_v41  ;;  %v2030_v39 = vld [vmem:[%s2369_s7 + $0x18] sm:$0xff]  }
  0xd6   : > { %v551_v40 = vpop.f32.mrf.mxu0 }
  0xd7   : > { %v552_v43 = vadd.f32 %v1656_v41, %v551_v40  ;;  %v616_v52 = vmax.f32 %v560_v45, 0.0 }
  0xd8   : > { %v1811_v42 = vpop.f32.mrf.mxu0 }
  0xd9   : > { %v563_v44 = vadd.f32 %v1811_v42, %v1656_v41  ;;  %v614_v50 = vmax.f32 %v552_v43, 0.0  ;;  %v1667_v42 = vld [vmem:[%s2366_s4] ss:$0 sm:$0xff] }
  0xda   : > { %v554_v46 = vpop.f32.mrf.mxu0 }
  0xdb   : > { %v555_v47 = vadd.f32 %v1656_v41, %v554_v46  ;;  %v617_v48 = vmax.f32 %v563_v44, 0.0 }
  0xdc   : > { %v1814_v49 = vpop.f32.mrf.mxu0 }
  0xdd   : > { %v615_v51 = vmax.f32 %v555_v47, 0.0  ;;  %v631_v55 = vpack.c.bf16 %v617_v48, %v616_v52  ;;  %v576_v59 = vadd.f32 %v1814_v49, %v1656_v41 }
  0xde   : > { %v567_v53 = vpop.f32.mrf.mxu0 }
  0xdf   : > { %v630_v54 = vpack.c.bf16 %v615_v51, %v614_v50  ;;  %v568_v57 = vadd.f32 %v1656_v41, %v567_v53  ;;  %v620_v2 = vmax.f32 %v576_v59, 0.0 }
  0xe0   : > { %v1815_v56 = vpop.f32.mrf.mxu0 }
  0xe1   : > { %v579_v58 = vadd.f32 %v1815_v56, %v1656_v41  ;;  %1840 = vmatprep.mubr.bf16.mxu1 %v630_v54  ;;  %v618_v0 = vmax.f32 %v568_v57, 0.0 }
  0xe2   : > { %v570_v60 = vpop.f32.mrf.mxu0  ;;  %1841 = vmatmul.mubr.bf16.vlgmr.msra.gmra.mxu1 %v631_v55 }
  0xe3   : > { %v571_v61 = vadd.f32 %v1656_v41, %v570_v60  ;;  %v621_v62 = vmax.f32 %v579_v58, 0.0  ;;  %1889 = vmatpush3.bf16.msra.mxu1 %v2026_v35  ;;  %v2033_v35 = vld [vmem:[%s2369_s7] sm:$0xff]  }
  0xe4   : > { %v1818_v63 = vpop.f32.mrf.mxu0  ;;  %1890 = vmatprep.subr.bf16.mxu1 %v2027_v36 }
  0xe5   : > { %v619_v1 = vmax.f32 %v571_v61, 0.0  ;;  %v633_v5 = vpack.c.bf16 %v621_v62, %v620_v2  ;;  %v592_v9 = vadd.f32 %v1818_v63, %v1656_v41 }
  0xe6   : > { %v583_v3 = vpop.f32.mrf.mxu0 }
  0xe7   : > { %v632_v4 = vpack.c.bf16 %v619_v1, %v618_v0  ;;  %v584_v7 = vadd.f32 %v1656_v41, %v583_v3  ;;  %v624_v16 = vmax.f32 %v592_v9, 0.0  ;;  %1891 = vmatpush3.bf16.msra.mxu1 %v2027_v36  ;;  %v2034_v36 = vld [vmem:[%s2371_s9 + $0x38] sm:$0xff]  }
  0xe8   : > { %v1819_v6 = vpop.f32.mrf.mxu0  ;;  %1892 = vmatprep.subr.bf16.mxu1 %v2028_v37  ;;  %1920 = vmatprep.subr.bf16.mxu0 %v2034_v36 }
  0xe9   : > { %v595_v8 = vadd.f32 %v1819_v6, %v1656_v41  ;;  %1844 = vmatprep.mubr.bf16.mxu1 %v632_v4  ;;  %v622_v14 = vmax.f32 %v584_v7, 0.0 }
  0xea   : > { %v586_v10 = vpop.f32.mrf.mxu0  ;;  %1845 = vmatmul.mubr.bf16.gmra.mxu1 %v633_v5 }
  0xeb   : > { %v587_v11 = vadd.f32 %v1656_v41, %v586_v10  ;;  %v625_v12 = vmax.f32 %v595_v8, 0.0  ;;  %1893 = vmatpush3.bf16.msra.mxu1 %v2028_v37  ;;  %v2035_v37 = vld [vmem:[%s2371_s9 + $0x30] sm:$0xff]  }
  0xec   : > { %v1822_v13 = vpop.f32.mrf.mxu0  ;;  %1894 = vmatprep.subr.bf16.mxu1 %v2029_v38 }
  0xed   : > { %v623_v15 = vmax.f32 %v587_v11, 0.0  ;;  %v635_v19 = vpack.c.bf16 %v625_v12, %v624_v16  ;;  %v608_v23 = vadd.f32 %v1822_v13, %v1656_v41 }
  0xee   : > { %v599_v17 = vpop.f32.mrf.mxu0 }
  0xef   : > { %v634_v18 = vpack.c.bf16 %v623_v15, %v622_v14  ;;  %v600_v21 = vadd.f32 %v1656_v41, %v599_v17  ;;  %v628_v29 = vmax.f32 %v608_v23, 0.0  ;;  %1895 = vmatpush3.bf16.msra.mxu1 %v2029_v38  ;;  %v2036_v38 = vld [vmem:[%s2371_s9 + $0x28] sm:$0xff]  }
  0xf0   : > { %v1823_v20 = vpop.f32.mrf.mxu0  ;;  %1896 = vmatprep.subr.bf16.mxu1 %v2030_v39 }
  0xf1   : > { %v611_v22 = vadd.f32 %v1823_v20, %v1656_v41  ;;  %1848 = vmatprep.mubr.bf16.mxu1 %v634_v18  ;;  %v626_v27 = vmax.f32 %v600_v21, 0.0 }
  0xf2   : > { %v602_v24 = vpop.f32.mrf.mxu0  ;;  %1849 = vmatmul.mubr.bf16.gmra.mxu1 %v635_v19 }
  0xf3   : > { %v603_v25 = vadd.f32 %v1656_v41, %v602_v24  ;;  %v629_v26 = vmax.f32 %v611_v22, 0.0  ;;  %1897 = vmatpush3.bf16.msra.mxu1 %v2030_v39  ;;  %v2037_v39 = vld [vmem:[%s2371_s9 + $0x20] sm:$0xff]  }
  0xf4   : > { %1898 = vmatprep.subr.bf16.mxu1 %v2031_v33 }
  0xf5   : > { %v627_v28 = vmax.f32 %v603_v25, 0.0  ;;  %v637_v31 = vpack.c.bf16 %v629_v26, %v628_v29 }
  0xf7   : > { %v636_v30 = vpack.c.bf16 %v627_v28, %v626_v27  ;;  %1899 = vmatpush3.bf16.msra.mxu1 %v2031_v33 }
  0xf8   : > { %1900 = vmatprep.subr.bf16.mxu1 %v2032_v34 }
  0xf9   : > { %1852 = vmatprep.mubr.bf16.mxu1 %v636_v30 }
  0xfa   : > { %1853 = vmatmul.mubr.bf16.gmra.mxu1 %v637_v31 }
  0xfb   : > { %1901 = vmatpush3.bf16.msra.mxu1 %v2032_v34  ;;  %v2039_v34 = vld [vmem:[%s2371_s9 + $0x10] sm:$0xff]  }
  0xfc   : > { %1902 = vmatprep.subr.bf16.mxu1 %v2033_v35 }
  0xff   : > { %1903 = vmatpush3.bf16.msra.mxu1 %v2033_v35  ;;  %v2040_v35 = vld [vmem:[%s2371_s9 + $0x8] sm:$0xff]  }
 0x1a2   : > { %v1842_v40 = vpop.f32.mrf.mxu1 }
 0x1a3   : > { %v752_v46 = vadd.f32 %v1842_v40, %v1667_v42  ;;  %v2038_v40 = vld [vmem:[%s2371_s9 + $0x18] sm:$0xff]  }
 0x1a4   : > { %v743_v41 = vpop.f32.mrf.mxu1 }
 0x1a5   : > { %v744_v44 = vadd.f32 %v1667_v42, %v743_v41  ;;  %v808_v53 = vmax.f32 %v752_v46, 0.0 }
 0x1a6   : > { %v1843_v43 = vpop.f32.mrf.mxu1 }
 0x1a7   : > { %v755_v45 = vadd.f32 %v1843_v43, %v1667_v42  ;;  %v806_v51 = vmax.f32 %v744_v44, 0.0  ;;  %v1676_v43 = vld [vmem:[%s2368_s6] ss:$0 sm:$0xff] }
 0x1a8   : > { %v746_v47 = vpop.f32.mrf.mxu1 }
 0x1a9   : > { %v747_v48 = vadd.f32 %v1667_v42, %v746_v47  ;;  %v809_v49 = vmax.f32 %v755_v45, 0.0 }
 0x1aa   : > { %v1846_v50 = vpop.f32.mrf.mxu1 }
 0x1ab   : > { %v807_v52 = vmax.f32 %v747_v48, 0.0  ;;  %v823_v56 = vpack.c.bf16 %v809_v49, %v808_v53  ;;  %v768_v60 = vadd.f32 %v1846_v50, %v1667_v42 }
 0x1ac   : > { %v759_v54 = vpop.f32.mrf.mxu1 }
 0x1ad   : > { %v822_v55 = vpack.c.bf16 %v807_v52, %v806_v51  ;;  %v760_v58 = vadd.f32 %v1667_v42, %v759_v54  ;;  %v812_v3 = vmax.f32 %v768_v60, 0.0 }
 0x1ae   : > { %v1847_v57 = vpop.f32.mrf.mxu1 }
 0x1af   : > { %v771_v59 = vadd.f32 %v1847_v57, %v1667_v42  ;;  %1872 = vmatprep.mubr.bf16.mxu0 %v822_v55  ;;  %v810_v1 = vmax.f32 %v760_v58, 0.0 }
 0x1b0   : > { %v762_v61 = vpop.f32.mrf.mxu1  ;;  %1873 = vmatmul.mubr.bf16.vlgmr.msra.gmra.mxu0 %v823_v56 }
 0x1b1   : > { %v763_v62 = vadd.f32 %v1667_v42, %v762_v61  ;;  %v813_v63 = vmax.f32 %v771_v59, 0.0  ;;  %1921 = vmatpush3.bf16.msra.mxu0 %v2034_v36  ;;  %v2041_v36 = vld [vmem:[%s2371_s9] sm:$0xff]  }
 0x1b2   : > { %v1850_v0 = vpop.f32.mrf.mxu1  ;;  %1922 = vmatprep.subr.bf16.mxu0 %v2035_v37 }
 0x1b3   : > { %v811_v2 = vmax.f32 %v763_v62, 0.0  ;;  %v825_v6 = vpack.c.bf16 %v813_v63, %v812_v3  ;;  %v784_v10 = vadd.f32 %v1850_v0, %v1667_v42 }
 0x1b4   : > { %v775_v4 = vpop.f32.mrf.mxu1 }
 0x1b5   : > { %v824_v5 = vpack.c.bf16 %v811_v2, %v810_v1  ;;  %v776_v8 = vadd.f32 %v1667_v42, %v775_v4  ;;  %v816_v17 = vmax.f32 %v784_v10, 0.0  ;;  %1923 = vmatpush3.bf16.msra.mxu0 %v2035_v37  ;;  %v2042_v37 = vld [vmem:[%s2373_s11 + $0x38] sm:$0xff]  }
 0x1b6   : > { %v1851_v7 = vpop.f32.mrf.mxu1  ;;  %1924 = vmatprep.subr.bf16.mxu0 %v2036_v38  ;;  %1984 = vmatprep.subr.bf16.mxu1 %v2042_v37 }
 0x1b7   : > { %v787_v9 = vadd.f32 %v1851_v7, %v1667_v42  ;;  %1876 = vmatprep.mubr.bf16.mxu0 %v824_v5  ;;  %v814_v15 = vmax.f32 %v776_v8, 0.0 }
 0x1b8   : > { %v778_v11 = vpop.f32.mrf.mxu1  ;;  %1877 = vmatmul.mubr.bf16.gmra.mxu0 %v825_v6 }
 0x1b9   : > { %v779_v12 = vadd.f32 %v1667_v42, %v778_v11  ;;  %v817_v13 = vmax.f32 %v787_v9, 0.0  ;;  %1925 = vmatpush3.bf16.msra.mxu0 %v2036_v38  ;;  %v2043_v38 = vld [vmem:[%s2373_s11 + $0x30] sm:$0xff]  }
 0x1ba   : > { %v1854_v14 = vpop.f32.mrf.mxu1  ;;  %1926 = vmatprep.subr.bf16.mxu0 %v2037_v39 }
 0x1bb   : > { %v815_v16 = vmax.f32 %v779_v12, 0.0  ;;  %v827_v20 = vpack.c.bf16 %v817_v13, %v816_v17  ;;  %v800_v24 = vadd.f32 %v1854_v14, %v1667_v42 }
 0x1bc   : > { %v791_v18 = vpop.f32.mrf.mxu1 }
 0x1bd   : > { %v826_v19 = vpack.c.bf16 %v815_v16, %v814_v15  ;;  %v792_v22 = vadd.f32 %v1667_v42, %v791_v18  ;;  %v820_v30 = vmax.f32 %v800_v24, 0.0  ;;  %1927 = vmatpush3.bf16.msra.mxu0 %v2037_v39  ;;  %v2044_v39 = vld [vmem:[%s2373_s11 + $0x28] sm:$0xff]  }
 0x1be   : > { %v1855_v21 = vpop.f32.mrf.mxu1  ;;  %1928 = vmatprep.subr.bf16.mxu0 %v2038_v40 }
 0x1bf   : > { %v803_v23 = vadd.f32 %v1855_v21, %v1667_v42  ;;  %1880 = vmatprep.mubr.bf16.mxu0 %v826_v19  ;;  %v818_v28 = vmax.f32 %v792_v22, 0.0 }
 0x1c0   : > { %v794_v25 = vpop.f32.mrf.mxu1  ;;  %1881 = vmatmul.mubr.bf16.gmra.mxu0 %v827_v20 }
 0x1c1   : > { %v795_v26 = vadd.f32 %v1667_v42, %v794_v25  ;;  %v821_v27 = vmax.f32 %v803_v23, 0.0  ;;  %1929 = vmatpush3.bf16.msra.mxu0 %v2038_v40  ;;  %v2045_v40 = vld [vmem:[%s2373_s11 + $0x20] sm:$0xff]  }
 0x1c2   : > { %1930 = vmatprep.subr.bf16.mxu0 %v2039_v34 }
 0x1c3   : > { %v819_v29 = vmax.f32 %v795_v26, 0.0  ;;  %v829_v32 = vpack.c.bf16 %v821_v27, %v820_v30 }
 0x1c5   : > { %v828_v31 = vpack.c.bf16 %v819_v29, %v818_v28  ;;  %1931 = vmatpush3.bf16.msra.mxu0 %v2039_v34 }
 0x1c6   : > { %1932 = vmatprep.subr.bf16.mxu0 %v2040_v35 }
 0x1c7   : > { %1884 = vmatprep.mubr.bf16.mxu0 %v828_v31 }
 0x1c8   : > { %1885 = vmatmul.mubr.bf16.gmra.mxu0 %v829_v32 }
 0x1c9   : > { %1933 = vmatpush3.bf16.msra.mxu0 %v2040_v35  ;;  %v2047_v35 = vld [vmem:[%s2373_s11 + $0x10] sm:$0xff]  }
 0x1ca   : > { %1934 = vmatprep.subr.bf16.mxu0 %v2041_v36 }
 0x1cd   : > { %1935 = vmatpush3.bf16.msra.mxu0 %v2041_v36  ;;  %v2048_v36 = vld [vmem:[%s2373_s11 + $0x8] sm:$0xff]  }
 0x1ce   : > { %1952 = vmatprep.subr.bf16.mxu0 %v2042_v37 }
 0x270   : > { %v1874_v41 = vpop.f32.mrf.mxu0 }
 0x271   : > { %v944_v47 = vadd.f32 %v1874_v41, %v1676_v43  ;;  %v2296_v41 = vld [vmem:[%s2373_s11 + $0x18] sm:$0xff]  }
 0x272   : > { %v935_v42 = vpop.f32.mrf.mxu0 }
 0x273   : > { %v936_v45 = vadd.f32 %v1676_v43, %v935_v42  ;;  %v1000_v54 = vmax.f32 %v944_v47, 0.0 }
 0x274   : > { %v1875_v44 = vpop.f32.mrf.mxu0 }
 0x275   : > { %v947_v46 = vadd.f32 %v1875_v44, %v1676_v43  ;;  %v998_v52 = vmax.f32 %v936_v45, 0.0  ;;  %v1685_v44 = vld [vmem:[%s2370_s8] ss:$0 sm:$0xff] }
 0x276   : > { %v938_v48 = vpop.f32.mrf.mxu0 }
 0x277   : > { %v939_v49 = vadd.f32 %v1676_v43, %v938_v48  ;;  %v1001_v50 = vmax.f32 %v947_v46, 0.0 }
 0x278   : > { %v1878_v51 = vpop.f32.mrf.mxu0 }
 0x279   : > { %v999_v53 = vmax.f32 %v939_v49, 0.0  ;;  %v1015_v57 = vpack.c.bf16 %v1001_v50, %v1000_v54  ;;  %v960_v61 = vadd.f32 %v1878_v51, %v1676_v43 }
 0x27a   : > { %v951_v55 = vpop.f32.mrf.mxu0 }
 0x27b   : > { %v1014_v56 = vpack.c.bf16 %v999_v53, %v998_v52  ;;  %v952_v59 = vadd.f32 %v1676_v43, %v951_v55  ;;  %v1004_v4 = vmax.f32 %v960_v61, 0.0 }
 0x27c   : > { %v1879_v58 = vpop.f32.mrf.mxu0 }
 0x27d   : > { %v963_v60 = vadd.f32 %v1879_v58, %v1676_v43  ;;  %1904 = vmatprep.mubr.bf16.mxu1 %v1014_v56  ;;  %v1002_v2 = vmax.f32 %v952_v59, 0.0 }
 0x27e   : > { %v954_v62 = vpop.f32.mrf.mxu0  ;;  %1905 = vmatmul.mubr.bf16.vlgmr.msra.gmra.mxu1 %v1015_v57 }
 0x27f   : > { %v955_v63 = vadd.f32 %v1676_v43, %v954_v62  ;;  %v1005_v0 = vmax.f32 %v963_v60, 0.0  ;;  %1992 = vmatpush3.bf16.msra.mxu1 %v2042_v37 }
 0x280   : > { %v1882_v1 = vpop.f32.mrf.mxu0  ;;  %1985 = vmatprep.subr.bf16.mxu1 %v2043_v38 }
 0x281   : > { %v1003_v3 = vmax.f32 %v955_v63, 0.0  ;;  %v1017_v7 = vpack.c.bf16 %v1005_v0, %v1004_v4  ;;  %v976_v11 = vadd.f32 %v1882_v1, %v1676_v43 }
 0x282   : > { %v967_v5 = vpop.f32.mrf.mxu0 }
 0x283   : > { %v1016_v6 = vpack.c.bf16 %v1003_v3, %v1002_v2  ;;  %v968_v9 = vadd.f32 %v1676_v43, %v967_v5  ;;  %v1008_v18 = vmax.f32 %v976_v11, 0.0  ;;  %1993 = vmatpush3.bf16.msra.mxu1 %v2043_v38 }
 0x284   : > { %v1883_v8 = vpop.f32.mrf.mxu0  ;;  %1986 = vmatprep.subr.bf16.mxu1 %v2044_v39 }
 0x285   : > { %v979_v10 = vadd.f32 %v1883_v8, %v1676_v43  ;;  %1908 = vmatprep.mubr.bf16.mxu1 %v1016_v6  ;;  %v1006_v16 = vmax.f32 %v968_v9, 0.0 }
 0x286   : > { %v970_v12 = vpop.f32.mrf.mxu0  ;;  %1909 = vmatmul.mubr.bf16.gmra.mxu1 %v1017_v7 }
 0x287   : > { %v971_v13 = vadd.f32 %v1676_v43, %v970_v12  ;;  %v1009_v14 = vmax.f32 %v979_v10, 0.0  ;;  %1994 = vmatpush3.bf16.msra.mxu1 %v2044_v39 }
 0x288   : > { %v1886_v15 = vpop.f32.mrf.mxu0  ;;  %1987 = vmatprep.subr.bf16.mxu1 %v2045_v40 }
 0x289   : > { %v1007_v17 = vmax.f32 %v971_v13, 0.0  ;;  %v1019_v21 = vpack.c.bf16 %v1009_v14, %v1008_v18  ;;  %v992_v25 = vadd.f32 %v1886_v15, %v1676_v43 }
 0x28a   : > { %v983_v19 = vpop.f32.mrf.mxu0 }
 0x28b   : > { %v1018_v20 = vpack.c.bf16 %v1007_v17, %v1006_v16  ;;  %v984_v23 = vadd.f32 %v1676_v43, %v983_v19  ;;  %v1012_v31 = vmax.f32 %v992_v25, 0.0  ;;  %1995 = vmatpush3.bf16.msra.mxu1 %v2045_v40 }
 0x28c   : > { %v1887_v22 = vpop.f32.mrf.mxu0  ;;  %1988 = vmatprep.subr.bf16.mxu1 %v2296_v41 }
 0x28d   : > { %v995_v24 = vadd.f32 %v1887_v22, %v1676_v43  ;;  %1912 = vmatprep.mubr.bf16.mxu1 %v1018_v20  ;;  %v1010_v29 = vmax.f32 %v984_v23, 0.0 }
 0x28e   : > { %v986_v26 = vpop.f32.mrf.mxu0  ;;  %1913 = vmatmul.mubr.bf16.gmra.mxu1 %v1019_v21 }
 0x28f   : > { %v987_v27 = vadd.f32 %v1676_v43, %v986_v26  ;;  %v1013_v28 = vmax.f32 %v995_v24, 0.0  ;;  %1996 = vmatpush3.bf16.msra.mxu1 %v2296_v41 }
 0x290   : > { %1989 = vmatprep.subr.bf16.mxu1 %v2047_v35 }
 0x291   : > { %v1011_v30 = vmax.f32 %v987_v27, 0.0  ;;  %v1021_v33 = vpack.c.bf16 %v1013_v28, %v1012_v31 }
 0x293   : > { %v1020_v32 = vpack.c.bf16 %v1011_v30, %v1010_v29  ;;  %1997 = vmatpush3.bf16.msra.mxu1 %v2047_v35 }
 0x294   : > { %1990 = vmatprep.subr.bf16.mxu1 %v2048_v36 }
 0x295   : > { %1916 = vmatprep.mubr.bf16.mxu1 %v1020_v32 }
 0x296   : > { %1917 = vmatmul.mubr.bf16.gmra.mxu1 %v1021_v33 }
 0x297   : > { %1998 = vmatpush3.bf16.msra.mxu1 %v2048_v36 }
 0x33e   : > { %v1906_v42 = vpop.f32.mrf.mxu1 }
 0x33f   : > { %v1136_v48 = vadd.f32 %v1906_v42, %v1685_v44 }
 0x340   : > { %v1127_v43 = vpop.f32.mrf.mxu1 }
 0x341   : > { %v1128_v46 = vadd.f32 %v1685_v44, %v1127_v43  ;;  %v1192_v55 = vmax.f32 %v1136_v48, 0.0 }
 0x342   : > { %v1907_v45 = vpop.f32.mrf.mxu1 }
 0x343   : > { %v1139_v47 = vadd.f32 %v1907_v45, %v1685_v44  ;;  %v1190_v53 = vmax.f32 %v1128_v46, 0.0 }
 0x344   : > { %v1130_v49 = vpop.f32.mrf.mxu1 }
 0x345   : > { %v1131_v50 = vadd.f32 %v1685_v44, %v1130_v49  ;;  %v1193_v51 = vmax.f32 %v1139_v47, 0.0 }
 0x346   : > { %v1910_v52 = vpop.f32.mrf.mxu1 }
 0x347   : > { %v1191_v54 = vmax.f32 %v1131_v50, 0.0  ;;  %v1207_v58 = vpack.c.bf16 %v1193_v51, %v1192_v55  ;;  %v1152_v62 = vadd.f32 %v1910_v52, %v1685_v44 }
 0x348   : > { %v1143_v56 = vpop.f32.mrf.mxu1 }
 0x349   : > { %v1206_v57 = vpack.c.bf16 %v1191_v54, %v1190_v53  ;;  %v1144_v60 = vadd.f32 %v1685_v44, %v1143_v56  ;;  %v1196_v5 = vmax.f32 %v1152_v62, 0.0 }
 0x34a   : > { %v1911_v59 = vpop.f32.mrf.mxu1 }
 0x34b   : > { %v1155_v61 = vadd.f32 %v1911_v59, %v1685_v44  ;;  %1936 = vmatprep.mubr.bf16.mxu0 %v1206_v57  ;;  %v1194_v3 = vmax.f32 %v1144_v60, 0.0 }
 0x34c   : > { %v1146_v63 = vpop.f32.mrf.mxu1  ;;  %1937 = vmatmul.mubr.bf16.vlgmr.msra.gmra.mxu0 %v1207_v58 }
 0x34d   : > { %v1147_v0 = vadd.f32 %v1685_v44, %v1146_v63  ;;  %1953 = vmatpush3.bf16.msra.mxu0 %v2042_v37  ;;  %v1197_v1 = vmax.f32 %v1155_v61, 0.0  ;;  %v2049_v37 = vld [vmem:[%s2373_s11] sm:$0xff]  }
 0x34e   : > { %v1914_v2 = vpop.f32.mrf.mxu1  ;;  %1954 = vmatprep.subr.bf16.mxu0 %v2043_v38  ;;  %1991 = vmatprep.subr.bf16.mxu1 %v2049_v37 }
 0x34f   : > { %v1195_v4 = vmax.f32 %v1147_v0, 0.0  ;;  %v1209_v8 = vpack.c.bf16 %v1197_v1, %v1196_v5  ;;  %v1168_v12 = vadd.f32 %v1914_v2, %v1685_v44  ;;  %1999 = vmatpush3.bf16.msra.mxu1 %v2049_v37 }
 0x350   : > { %v1159_v6 = vpop.f32.mrf.mxu1 }
 0x351   : > { %v1208_v7 = vpack.c.bf16 %v1195_v4, %v1194_v3  ;;  %1955 = vmatpush3.bf16.msra.mxu0 %v2043_v38  ;;  %v1160_v10 = vadd.f32 %v1685_v44, %v1159_v6  ;;  %v1200_v19 = vmax.f32 %v1168_v12, 0.0 }
 0x352   : > { %v1915_v9 = vpop.f32.mrf.mxu1  ;;  %1956 = vmatprep.subr.bf16.mxu0 %v2044_v39 }
 0x353   : > { %v1171_v11 = vadd.f32 %v1915_v9, %v1685_v44  ;;  %1940 = vmatprep.mubr.bf16.mxu0 %v1208_v7  ;;  %v1198_v17 = vmax.f32 %v1160_v10, 0.0 }
 0x354   : > { %v1162_v13 = vpop.f32.mrf.mxu1  ;;  %1941 = vmatmul.mubr.bf16.gmra.mxu0 %v1209_v8 }
 0x355   : > { %v1163_v14 = vadd.f32 %v1685_v44, %v1162_v13  ;;  %1957 = vmatpush3.bf16.msra.mxu0 %v2044_v39  ;;  %v1201_v15 = vmax.f32 %v1171_v11, 0.0 }
 0x356   : > { %v1918_v16 = vpop.f32.mrf.mxu1  ;;  %1958 = vmatprep.subr.bf16.mxu0 %v2045_v40 }
 0x357   : > { %v1199_v18 = vmax.f32 %v1163_v14, 0.0  ;;  %v1211_v22 = vpack.c.bf16 %v1201_v15, %v1200_v19  ;;  %v1184_v26 = vadd.f32 %v1918_v16, %v1685_v44 }
 0x358   : > { %v1175_v20 = vpop.f32.mrf.mxu1 }
 0x359   : > { %v1210_v21 = vpack.c.bf16 %v1199_v18, %v1198_v17  ;;  %1959 = vmatpush3.bf16.msra.mxu0 %v2045_v40  ;;  %v1176_v24 = vadd.f32 %v1685_v44, %v1175_v20  ;;  %v1204_v32 = vmax.f32 %v1184_v26, 0.0  ;;  %v1694_v40 = vld [vmem:[%s2372_s10] ss:$0 sm:$0xff] }
 0x35a   : > { %v1919_v23 = vpop.f32.mrf.mxu1  ;;  %1960 = vmatprep.subr.bf16.mxu0 %v2296_v41 }
 0x35b   : > { %v1187_v25 = vadd.f32 %v1919_v23, %v1685_v44  ;;  %1944 = vmatprep.mubr.bf16.mxu0 %v1210_v21  ;;  %v1202_v30 = vmax.f32 %v1176_v24, 0.0 }
 0x35c   : > { %v1178_v27 = vpop.f32.mrf.mxu1  ;;  %1945 = vmatmul.mubr.bf16.gmra.mxu0 %v1211_v22 }
 0x35d   : > { %v1179_v28 = vadd.f32 %v1685_v44, %v1178_v27  ;;  %1961 = vmatpush3.bf16.msra.mxu0 %v2296_v41  ;;  %v1205_v29 = vmax.f32 %v1187_v25, 0.0 }
 0x35e   : > { %1962 = vmatprep.subr.bf16.mxu0 %v2047_v35 }
 0x35f   : > { %v1203_v31 = vmax.f32 %v1179_v28, 0.0  ;;  %v1213_v34 = vpack.c.bf16 %v1205_v29, %v1204_v32 }
 0x361   : > { %v1212_v33 = vpack.c.bf16 %v1203_v31, %v1202_v30  ;;  %1963 = vmatpush3.bf16.msra.mxu0 %v2047_v35  ;;  %v1703_v31 = vld [vmem:[%s2374_s12] ss:$0 sm:$0xff] }
 0x362   : > { %1964 = vmatprep.subr.bf16.mxu0 %v2048_v36 }
 0x363   : > { %1948 = vmatprep.mubr.bf16.mxu0 %v1212_v33 }
 0x364   : > { %1949 = vmatmul.mubr.bf16.gmra.mxu0 %v1213_v34 }
 0x365   : > { %1965 = vmatpush3.bf16.msra.mxu0 %v2048_v36 }
 0x366   : > { %1966 = vmatprep.subr.bf16.mxu0 %v2049_v37 }
 0x369   : > { %1967 = vmatpush3.bf16.msra.mxu0 %v2049_v37 }
 0x40c   : > { %v1938_v38 = vpop.f32.mrf.mxu0 }
 0x40d   : > { %v1328_v44 = vadd.f32 %v1938_v38, %v1694_v40 }
 0x40e   : > { %v1319_v39 = vpop.f32.mrf.mxu0 }
 0x40f   : > { %v1320_v42 = vadd.f32 %v1694_v40, %v1319_v39  ;;  %v1384_v51 = vmax.f32 %v1328_v44, 0.0 }
 0x410   : > { %v1939_v41 = vpop.f32.mrf.mxu0 }
 0x411   : > { %v1331_v43 = vadd.f32 %v1939_v41, %v1694_v40  ;;  %v1382_v49 = vmax.f32 %v1320_v42, 0.0 }
 0x412   : > { %v1322_v45 = vpop.f32.mrf.mxu0 }
 0x413   : > { %v1323_v46 = vadd.f32 %v1694_v40, %v1322_v45  ;;  %v1385_v47 = vmax.f32 %v1331_v43, 0.0 }
 0x414   : > { %v1942_v48 = vpop.f32.mrf.mxu0 }
 0x415   : > { %v1383_v50 = vmax.f32 %v1323_v46, 0.0  ;;  %v1399_v54 = vpack.c.bf16 %v1385_v47, %v1384_v51  ;;  %v1344_v58 = vadd.f32 %v1942_v48, %v1694_v40 }
 0x416   : > { %v1335_v52 = vpop.f32.mrf.mxu0 }
 0x417   : > { %v1398_v53 = vpack.c.bf16 %v1383_v50, %v1382_v49  ;;  %v1336_v56 = vadd.f32 %v1694_v40, %v1335_v52  ;;  %v1388_v1 = vmax.f32 %v1344_v58, 0.0 }
 0x418   : > { %v1943_v55 = vpop.f32.mrf.mxu0 }
 0x419   : > { %v1347_v57 = vadd.f32 %v1943_v55, %v1694_v40  ;;  %1968 = vmatprep.mubr.bf16.mxu0 %v1398_v53  ;;  %v1386_v63 = vmax.f32 %v1336_v56, 0.0 }
 0x41a   : > { %v1338_v59 = vpop.f32.mrf.mxu0  ;;  %1969 = vmatmul.mubr.bf16.vlgmr.msra.gmra.mxu0 %v1399_v54 }
 0x41b   : > { %v1339_v60 = vadd.f32 %v1694_v40, %v1338_v59  ;;  %v1389_v61 = vmax.f32 %v1347_v57, 0.0 }
 0x41c   : > { %v1946_v62 = vpop.f32.mrf.mxu0 }
 0x41d   : > { %v1387_v0 = vmax.f32 %v1339_v60, 0.0  ;;  %v1401_v4 = vpack.c.bf16 %v1389_v61, %v1388_v1  ;;  %v1360_v8 = vadd.f32 %v1946_v62, %v1694_v40 }
 0x41e   : > { %v1351_v2 = vpop.f32.mrf.mxu0 }
 0x41f   : > { %v1400_v3 = vpack.c.bf16 %v1387_v0, %v1386_v63  ;;  %v1352_v6 = vadd.f32 %v1694_v40, %v1351_v2  ;;  %v1392_v15 = vmax.f32 %v1360_v8, 0.0 }
 0x420   : > { %v1947_v5 = vpop.f32.mrf.mxu0 }
 0x421   : > { %v1363_v7 = vadd.f32 %v1947_v5, %v1694_v40  ;;  %1972 = vmatprep.mubr.bf16.mxu1 %v1400_v3  ;;  %v1390_v13 = vmax.f32 %v1352_v6, 0.0 }
 0x422   : > { %v1354_v9 = vpop.f32.mrf.mxu0  ;;  %1973 = vmatmul.mubr.bf16.vlgmr.msra.gmra.mxu1 %v1401_v4 }
 0x423   : > { %v1355_v10 = vadd.f32 %v1694_v40, %v1354_v9  ;;  %v1393_v11 = vmax.f32 %v1363_v7, 0.0 }
 0x424   : > { %v1950_v12 = vpop.f32.mrf.mxu0 }
 0x425   : > { %v1391_v14 = vmax.f32 %v1355_v10, 0.0  ;;  %v1403_v18 = vpack.c.bf16 %v1393_v11, %v1392_v15  ;;  %v1376_v22 = vadd.f32 %v1950_v12, %v1694_v40 }
 0x426   : > { %v1367_v16 = vpop.f32.mrf.mxu0 }
 0x427   : > { %v1402_v17 = vpack.c.bf16 %v1391_v14, %v1390_v13  ;;  %v1368_v20 = vadd.f32 %v1694_v40, %v1367_v16  ;;  %v1396_v28 = vmax.f32 %v1376_v22, 0.0 }
 0x428   : > { %v1951_v19 = vpop.f32.mrf.mxu0 }
 0x429   : > { %v1379_v21 = vadd.f32 %v1951_v19, %v1694_v40  ;;  %1976 = vmatprep.mubr.bf16.mxu1 %v1402_v17  ;;  %v1394_v26 = vmax.f32 %v1368_v20, 0.0 }
 0x42a   : > { %v1370_v23 = vpop.f32.mrf.mxu0  ;;  %1977 = vmatmul.mubr.bf16.gmra.mxu1 %v1403_v18 }
 0x42b   : > { %v1371_v24 = vadd.f32 %v1694_v40, %v1370_v23  ;;  %v1397_v25 = vmax.f32 %v1379_v21, 0.0 }
 0x42d   : > { %v1395_v27 = vmax.f32 %v1371_v24, 0.0  ;;  %v1405_v30 = vpack.c.bf16 %v1397_v25, %v1396_v28 }
 0x42f   : > { %v1404_v29 = vpack.c.bf16 %v1395_v27, %v1394_v26 }
 0x431   : > { %1980 = vmatprep.mubr.bf16.mxu1 %v1404_v29 }
 0x432   : > { %1981 = vmatmul.mubr.bf16.gmra.mxu1 %v1405_v30 }
 0x4da   : > { %v1970_v32 = vpop.f32.mrf.mxu0 }
 0x4db   : > { %v1520_v33 = vadd.f32 %v1970_v32, %v1703_v31 }
 0x4dc   : > { %v1511_v34 = vpop.f32.mrf.mxu0 }
 0x4dd   : > { %1577 = vst.msk [vmem:[%s2325_s14 + $0x10] sm:$0xff] %vm1574_vm1, %v1520_v33  ;;  %v1512_v35 = vadd.f32 %v1703_v31, %v1511_v34 }
 0x4de   : > { %v1971_v36 = vpop.f32.mrf.mxu0 }
 0x4df   : > { %1575 = vst.msk [vmem:[%s2325_s14] sm:$0xff] %vm1574_vm1, %v1512_v35  ;;  %v1523_v37 = vadd.f32 %v1971_v36, %v1703_v31 }
 0x4e0   : > { %v1514_v38 = vpop.f32.mrf.mxu0 }
 0x4e1   : > { %1578 = vst.msk [vmem:[%s2325_s14 + $0x18] sm:$0xff] %vm1574_vm1, %v1523_v37  ;;  %v1515_v39 = vadd.f32 %v1703_v31, %v1514_v38 }
 0x4e2   : > { %v1974_v40 = vpop.f32.mrf.mxu1 }
 0x4e3   : > { %1576 = vst.msk [vmem:[%s2325_s14 + $0x8] sm:$0xff] %vm1574_vm1, %v1515_v39  ;;  %v1536_v41 = vadd.f32 %v1974_v40, %v1703_v31 }
 0x4e4   : > { %v1527_v42 = vpop.f32.mrf.mxu1 }
 0x4e5   : > { %1581 = vst.msk [vmem:[%s2325_s14 + $0x30] sm:$0xff] %vm1574_vm1, %v1536_v41  ;;  %v1528_v43 = vadd.f32 %v1703_v31, %v1527_v42 }
 0x4e6   : > { %v1975_v44 = vpop.f32.mrf.mxu1 }
 0x4e7   : > { %1579 = vst.msk [vmem:[%s2325_s14 + $0x20] sm:$0xff] %vm1574_vm1, %v1528_v43  ;;  %v1539_v45 = vadd.f32 %v1975_v44, %v1703_v31 }
 0x4e8   : > { %v1530_v46 = vpop.f32.mrf.mxu1 }
 0x4e9   : > { %1582 = vst.msk [vmem:[%s2325_s14 + $0x38] sm:$0xff] %vm1574_vm1, %v1539_v45  ;;  %v1531_v47 = vadd.f32 %v1703_v31, %v1530_v46 }
 0x4ea   : > { %v1978_v48 = vpop.f32.mrf.mxu1 }
 0x4eb   : > { %1580 = vst.msk [vmem:[%s2325_s14 + $0x28] sm:$0xff] %vm1574_vm1, %v1531_v47  ;;  %v1552_v49 = vadd.f32 %v1978_v48, %v1703_v31 }
 0x4ec   : > { %v1543_v50 = vpop.f32.mrf.mxu1 }
 0x4ed   : > { %1585 = vst.msk [vmem:[%s2325_s14 + $0x50] sm:$0xff] %vm1574_vm1, %v1552_v49  ;;  %v1544_v51 = vadd.f32 %v1703_v31, %v1543_v50 }
 0x4ee   : > { %v1979_v52 = vpop.f32.mrf.mxu1 }
 0x4ef   : > { %1583 = vst.msk [vmem:[%s2325_s14 + $0x40] sm:$0xff] %vm1574_vm1, %v1544_v51  ;;  %v1555_v53 = vadd.f32 %v1979_v52, %v1703_v31 }
 0x4f0   : > { %v1546_v54 = vpop.f32.mrf.mxu1 }
 0x4f1   : > { %1586 = vst.msk [vmem:[%s2325_s14 + $0x58] sm:$0xff] %vm1574_vm1, %v1555_v53  ;;  %v1547_v55 = vadd.f32 %v1703_v31, %v1546_v54 }
 0x4f2   : > { %v1982_v56 = vpop.f32.mrf.mxu1 }
 0x4f3   : > { %1584 = vst.msk [vmem:[%s2325_s14 + $0x48] sm:$0xff] %vm1574_vm1, %v1547_v55  ;;  %v1568_v57 = vadd.f32 %v1982_v56, %v1703_v31 }
 0x4f4   : > { %v1559_v58 = vpop.f32.mrf.mxu1 }
 0x4f5   : > { %1589 = vst.msk [vmem:[%s2325_s14 + $0x70] sm:$0xff] %vm1574_vm1, %v1568_v57  ;;  %v1560_v59 = vadd.f32 %v1703_v31, %v1559_v58 }
 0x4f6   : > { %v1983_v60 = vpop.f32.mrf.mxu1 }
 0x4f7   : > { %1587 = vst.msk [vmem:[%s2325_s14 + $0x60] sm:$0xff] %vm1574_vm1, %v1560_v59  ;;  %v1571_v61 = vadd.f32 %v1983_v60, %v1703_v31 }
 0x4f8   : > { %v1562_v62 = vpop.f32.mrf.mxu1 }
 0x4f9   : > { %1590 = vst.msk [vmem:[%s2325_s14 + $0x78] sm:$0xff] %vm1574_vm1, %v1571_v61  ;;  %v1563_v63 = vadd.f32 %v1703_v31, %v1562_v62 }
 0x4fb   : > { %1588 = vst.msk [vmem:[%s2325_s14 + $0x68] sm:$0xff] %vm1574_vm1, %v1563_v63 }
 0x4fc PF: > { %s23_s25 = sadd.s32 1, %s2056_s25  }
 0x4fd   : > { %p20_p4 = scmp.ge.s32.totalorder %s23_s25, 4  }
 0x4ff   :  { %22 = sbr.rel (!%p20_p4) target bundleno = 1 (0x1), region = 102 }

</bundles_post_ra>
